<compile_context>
chip_gen: v6e
topology: v6e:2x2x1
jax: 0.10.0
libtpu: 0.0.40
codegen_flags: <defaults>
</compile_context>

<pallas_src>
import numpy as np
import jax
import jax.numpy as jnp
from jax import lax
from jax.experimental import pallas as pl
from jax.experimental.pallas import tpu as pltpu


def critic_kernel(x_ref, w1_ref, b1_ref, w2_ref, b2_ref, w3t_ref, b3_ref, o_ref):
    # x tile: (TM, D) f32 -> bf16 cast on the VPU (free under MXU slack).
    x = x_ref[...].astype(jnp.bfloat16)

    # Layer 1: Linear + LeakyReLU(0.2). bf16 MXU matmul, f32 accumulate/epilogue.
    h1 = jnp.dot(x, w1_ref[...], preferred_element_type=jnp.float32) + b1_ref[...]
    h1 = jnp.maximum(h1, 0.2 * h1)

    # Layer 2: Linear + LeakyReLU(0.2)
    h2 = jnp.dot(h1.astype(jnp.bfloat16), w2_ref[...],
                 preferred_element_type=jnp.float32) + b2_ref[...]
    h2 = jnp.maximum(h2, 0.2 * h2)

    # Layer 3: validity[m] = sum_d h2[m, d] * w3[d, 0] + b3.  Computed as a
    # (1, 256) x (TM, 256)^T contraction so the result is already a lane-dense
    # (1, TM) row -- the kernel stores TM*4 bytes per tile instead of a padded
    # (TM, 128) slab that the wrapper would have to re-read and slice.
    row = lax.dot_general(
        w3t_ref[...], h2.astype(jnp.bfloat16),
        dimension_numbers=(((1,), (1,)), ((), ())),
        preferred_element_type=jnp.float32)                     # (1, TM)
    o_ref[...] = (row + b3_ref[...])[None].astype(o_ref.dtype)  # (1, 1, TM)


def _select_batch_tile(B):
    """Pick (TM, B_pad).  Prefers large tiles, exact divisors (no x padding),
    and an even tile count >= 2 so the 'parallel' batch axis shards across
    both v7x TensorCores."""
    for tm in (1024, 512, 256, 128, 64):
        if B % tm == 0 and (B // tm) >= 2 and (B // tm) % 2 == 0:
            return tm, B
    for tm in (1024, 512, 256, 128):
        if B % tm == 0:
            return tm, B
    if B <= 1024:
        # Small / ragged batch: one tile, batch rounded up to a sublane multiple
        # (block == full array, so the (8,128) constraint is satisfied).
        tm = max(8, pl.cdiv(B, 8) * 8)
        return tm, tm
    # Large ragged batch: pad to a multiple of 256 (keeps MXU M-dim filled).
    return 256, pl.cdiv(B, 256) * 256


def prepare_critic_params(params):
    """One-time conversion of f32 (PyTorch-layout) params to the kernel layout:
    bf16 weights, f32 (1, N) biases, final layer stored transposed as (1, 256).
    Hoisted out of the forward path so the big w1 cast is not a per-call HBM pass."""
    w1, b1, w2, b2, w3, b3 = params
    return (w1.astype(jnp.bfloat16), b1.reshape(1, -1).astype(jnp.float32),
            w2.astype(jnp.bfloat16), b2.reshape(1, -1).astype(jnp.float32),
            w3.T.astype(jnp.bfloat16), b3.reshape(1, 1).astype(jnp.float32))


@jax.jit
def critic_forward(img, prepared_params):
    """img: (B, C, H, W) float32. Returns (B, 1) validity scores."""
    w1, b1, w2, b2, w3t, b3 = prepared_params
    B = img.shape[0]
    x = img.reshape(B, -1)            # stays f32; bf16 cast happens in-kernel
    D = x.shape[1]

    TM, B_pad = _select_batch_tile(B)
    if B_pad != B:
        x = jnp.pad(x, ((0, B_pad - B), (0, 0)))
    n_tiles = B_pad // TM

    # TODO(synk): for very large img_shape (w1 bf16 approaching the 32-64 MiB
    # VMEM budget, esp. v7x), add an innermost "arbitrary" K grid axis tiling
    # x/w1 along D with an f32 VMEM accumulator initialized under
    # pl.when(k == 0); not needed at these layer sizes.
    # Note: weights could also be single-buffered (pipeline_mode=pl.Buffered(1))
    # since their block index never changes; left at default for portability.

    const = lambda i: (0, 0)  # weights/biases resident across batch tiles

    out = pl.pallas_call(
        critic_kernel,
        out_shape=jax.ShapeDtypeStruct((n_tiles, 1, TM), jnp.float32),
        grid=(n_tiles,),
        in_specs=[
            pl.BlockSpec((TM, D), lambda i: (i, 0)),   # x (f32)
            pl.BlockSpec(w1.shape, const),             # w1 (D, 512) bf16
            pl.BlockSpec(b1.shape, const),             # b1 (1, 512) f32
            pl.BlockSpec(w2.shape, const),             # w2 (512, 256) bf16
            pl.BlockSpec(b2.shape, const),             # b2 (1, 256) f32
            pl.BlockSpec(w3t.shape, const),            # w3^T (1, 256) bf16
            pl.BlockSpec(b3.shape, const),             # b3 (1, 1) f32
        ],
        out_specs=pl.BlockSpec((1, 1, TM), lambda i: (i, 0, 0)),
        compiler_params=pltpu.CompilerParams(
            dimension_semantics=("parallel",),
            vmem_limit_bytes=48 * 1024 * 1024,   # headroom for large TM/D; < v7x 64 MiB
        ),
    )(x, w1, b1, w2, b2, w3t, b3)

    # (n_tiles, 1, TM) -> (B_pad, 1) -> drop batch padding.
    return out.reshape(B_pad, 1)[:B]


def init_params(key, in_features):
    """Deterministic init mimicking PyTorch nn.Linear default:
       U(-1/sqrt(fan_in), 1/sqrt(fan_in)); weights stored as (in, out), f32."""
    dims = [(in_features, 512), (512, 256), (256, 1)]
    keys = jax.random.split(key, 2 * len(dims))
    params = []
    for i, (fan_in, fan_out) in enumerate(dims):
        bound = 1.0 / np.sqrt(fan_in)
        w = jax.random.uniform(keys[2 * i], (fan_in, fan_out),
                               minval=-bound, maxval=bound, dtype=jnp.float32)
        b = jax.random.uniform(keys[2 * i + 1], (1, fan_out),
                               minval=-bound, maxval=bound, dtype=jnp.float32)
        params.extend([w, b])
    return tuple(params)


def critic_reference(img, params):
    """Pure-JAX f32 reference of the PyTorch forward."""
    w1, b1, w2, b2, w3, b3 = params
    x = img.reshape(img.shape[0], -1)
    h1 = x @ w1 + b1
    h1 = jnp.where(h1 > 0, h1, 0.2 * h1)
    h2 = h1 @ w2 + b2
    h2 = jnp.where(h2 > 0, h2, 0.2 * h2)
    return h2 @ w3 + b3


if __name__ == "__main__":
    key = jax.random.PRNGKey(0)
    k_img, k_params, k_img2 = jax.random.split(key, 3)

    # Small InfoGAN-style image: (B, C, H, W) = (2, 1, 16, 16) -> 256 features
    img_shape = (1, 16, 16)
    B = 2
    img = jax.random.normal(k_img, (B,) + img_shape, dtype=jnp.float32)

    params = init_params(k_params, int(np.prod(img_shape)))
    prepared = prepare_critic_params(params)   # one-time weight prep (hoisted)

    validity = critic_forward(img, prepared)
    validity = jax.block_until_ready(validity)

    ref = critic_reference(img, params)
    assert validity.shape == (B, 1)
    # bf16 matmuls with f32 accumulation: loosened tolerance vs f32 reference.
    np.testing.assert_allclose(np.asarray(validity), np.asarray(ref),
                               rtol=5e-2, atol=5e-2)

    # Also exercise the multi-tile (grid > 1, even tile count) path.
    B2 = 256
    img2 = jax.random.normal(k_img2, (B2,) + img_shape, dtype=jnp.float32)
    validity2 = jax.block_until_ready(critic_forward(img2, prepared))
    ref2 = critic_reference(img2, params)
    assert validity2.shape == (B2, 1)
    np.testing.assert_allclose(np.asarray(validity2), np.asarray(ref2),
                               rtol=5e-2, atol=5e-2)

    print("KERNEL_OK")
</pallas_src>

<mosaic_0001>
module attributes {stable_mosaic.version = 11 : i64} {
  func.func @critic_kernel(%arg0: i32, %arg1: memref<8x256xf32, #tpu.memory_space<vmem>>, %arg2: memref<256x512xbf16, #tpu.memory_space<vmem>>, %arg3: memref<1x512xf32, #tpu.memory_space<vmem>>, %arg4: memref<512x256xbf16, #tpu.memory_space<vmem>>, %arg5: memref<1x256xf32, #tpu.memory_space<vmem>>, %arg6: memref<1x256xbf16, #tpu.memory_space<vmem>>, %arg7: memref<1x1xf32, #tpu.memory_space<vmem>>, %arg8: memref<1x1x8xf32, #tpu.memory_space<vmem>>) attributes {dimension_semantics = [#tpu.dimension_semantics<parallel>], iteration_bounds = array<i64: 1>, scalar_prefetch = 0 : i64, scratch_operands = 0 : i64, tpu.core_type = #tpu.core_type<tc>, window_params = [{transform_indices = @transform_0, window_bounds = array<i64: 8, 256>}, {pipeline_mode = #tpu.pipeline_mode<synchronous>, transform_indices = @transform_1, window_bounds = array<i64: 256, 512>}, {pipeline_mode = #tpu.pipeline_mode<synchronous>, transform_indices = @transform_2, window_bounds = array<i64: 1, 512>}, {pipeline_mode = #tpu.pipeline_mode<synchronous>, transform_indices = @transform_3, window_bounds = array<i64: 512, 256>}, {pipeline_mode = #tpu.pipeline_mode<synchronous>, transform_indices = @transform_4, window_bounds = array<i64: 1, 256>}, {pipeline_mode = #tpu.pipeline_mode<synchronous>, transform_indices = @transform_5, window_bounds = array<i64: 1, 256>}, {pipeline_mode = #tpu.pipeline_mode<synchronous>, transform_indices = @transform_6, window_bounds = array<i64: 1, 1>}, {transform_indices = @transform_7, window_bounds = array<i64: 1, 1, 8>}]} {
    %c0 = arith.constant 0 : index
    %c0_0 = arith.constant 0 : index
    %0 = vector.load %arg1[%c0, %c0_0] : memref<8x256xf32, #tpu.memory_space<vmem>>, vector<8x256xf32>
    %1 = arith.truncf %0 : vector<8x256xf32> to vector<8x256xbf16>
    %c0_1 = arith.constant 0 : index
    %c0_2 = arith.constant 0 : index
    %2 = vector.load %arg2[%c0_1, %c0_2] : memref<256x512xbf16, #tpu.memory_space<vmem>>, vector<256x512xbf16>
    %cst = arith.constant dense<0.000000e+00> : vector<8x512xf32>
    %3 = tpu.matmul %1, %2, %cst {dimension_numbers = #tpu.dot_dimension_numbers<[1], [0], [0], [1], [0, 0, 1, 1], [], []>} : vector<8x256xbf16>, vector<256x512xbf16>, vector<8x512xf32> -> vector<8x512xf32>
    %c0_3 = arith.constant 0 : index
    %c0_4 = arith.constant 0 : index
    %4 = vector.load %arg3[%c0_3, %c0_4] : memref<1x512xf32, #tpu.memory_space<vmem>>, vector<1x512xf32>
    %5 = vector.broadcast %4 : vector<1x512xf32> to vector<8x512xf32>
    %6 = arith.addf %3, %5 : vector<8x512xf32>
    %cst_5 = arith.constant 2.000000e-01 : f32
    %7 = vector.broadcast %cst_5 : f32 to vector<8x512xf32>
    %8 = arith.mulf %7, %6 : vector<8x512xf32>
    %9 = arith.maximumf %6, %8 : vector<8x512xf32>
    %10 = arith.truncf %9 : vector<8x512xf32> to vector<8x512xbf16>
    %c0_6 = arith.constant 0 : index
    %c0_7 = arith.constant 0 : index
    %11 = vector.load %arg4[%c0_6, %c0_7] : memref<512x256xbf16, #tpu.memory_space<vmem>>, vector<512x256xbf16>
    %cst_8 = arith.constant dense<0.000000e+00> : vector<8x256xf32>
    %12 = tpu.matmul %10, %11, %cst_8 {dimension_numbers = #tpu.dot_dimension_numbers<[1], [0], [0], [1], [0, 0, 1, 1], [], []>} : vector<8x512xbf16>, vector<512x256xbf16>, vector<8x256xf32> -> vector<8x256xf32>
    %c0_9 = arith.constant 0 : index
    %c0_10 = arith.constant 0 : index
    %13 = vector.load %arg5[%c0_9, %c0_10] : memref<1x256xf32, #tpu.memory_space<vmem>>, vector<1x256xf32>
    %14 = vector.broadcast %13 : vector<1x256xf32> to vector<8x256xf32>
    %15 = arith.addf %12, %14 : vector<8x256xf32>
    %cst_11 = arith.constant 2.000000e-01 : f32
    %16 = vector.broadcast %cst_11 : f32 to vector<8x256xf32>
    %17 = arith.mulf %16, %15 : vector<8x256xf32>
    %18 = arith.maximumf %15, %17 : vector<8x256xf32>
    %c0_12 = arith.constant 0 : index
    %c0_13 = arith.constant 0 : index
    %19 = vector.load %arg6[%c0_12, %c0_13] : memref<1x256xbf16, #tpu.memory_space<vmem>>, vector<1x256xbf16>
    %20 = arith.truncf %18 : vector<8x256xf32> to vector<8x256xbf16>
    %cst_14 = arith.constant dense<0.000000e+00> : vector<1x8xf32>
    %21 = tpu.matmul %19, %20, %cst_14 {dimension_numbers = #tpu.dot_dimension_numbers<[1], [1], [0], [0], [0, 0, 1, 0], [], []>} : vector<1x256xbf16>, vector<8x256xbf16>, vector<1x8xf32> -> vector<1x8xf32>
    %c0_15 = arith.constant 0 : index
    %c0_16 = arith.constant 0 : index
    %22 = vector.load %arg7[%c0_15, %c0_16] : memref<1x1xf32, #tpu.memory_space<vmem>>, vector<1x1xf32>
    %23 = vector.broadcast %22 : vector<1x1xf32> to vector<1x8xf32>
    %24 = arith.addf %21, %23 : vector<1x8xf32>
    %25 = vector.shape_cast %24 : vector<1x8xf32> to vector<1x1x8xf32>
    %c0_17 = arith.constant 0 : index
    %c0_18 = arith.constant 0 : index
    %c0_19 = arith.constant 0 : index
    %26 = vector.load %arg8[%c0_17, %c0_18, %c0_19] : memref<1x1x8xf32, #tpu.memory_space<vmem>>, vector<1x1x8xf32>
    tpu.vector_store %arg8[%c0_17, %c0_18, %c0_19], %25 {strides = array<i32>} : memref<1x1x8xf32, #tpu.memory_space<vmem>>, vector<1x1x8xf32>,
    return
  }
  func.func @transform_0(%arg0: i32) -> (i32, i32) {
    %c0_i32 = arith.constant 0 : i32
    %c0_i32_0 = arith.constant 0 : i32
    return %arg0, %c0_i32 : i32, i32
  }
  func.func @transform_1(%arg0: i32) -> (i32, i32) {
    %c0_i32 = arith.constant 0 : i32
    %c0_i32_0 = arith.constant 0 : i32
    %c0_i32_1 = arith.constant 0 : i32
    return %c0_i32, %c0_i32_0 : i32, i32
  }
  func.func @transform_2(%arg0: i32) -> (i32, i32) {
    %c0_i32 = arith.constant 0 : i32
    %c0_i32_0 = arith.constant 0 : i32
    %c0_i32_1 = arith.constant 0 : i32
    return %c0_i32, %c0_i32_0 : i32, i32
  }
  func.func @transform_3(%arg0: i32) -> (i32, i32) {
    %c0_i32 = arith.constant 0 : i32
    %c0_i32_0 = arith.constant 0 : i32
    %c0_i32_1 = arith.constant 0 : i32
    return %c0_i32, %c0_i32_0 : i32, i32
  }
  func.func @transform_4(%arg0: i32) -> (i32, i32) {
    %c0_i32 = arith.constant 0 : i32
    %c0_i32_0 = arith.constant 0 : i32
    %c0_i32_1 = arith.constant 0 : i32
    return %c0_i32, %c0_i32_0 : i32, i32
  }
  func.func @transform_5(%arg0: i32) -> (i32, i32) {
    %c0_i32 = arith.constant 0 : i32
    %c0_i32_0 = arith.constant 0 : i32
    %c0_i32_1 = arith.constant 0 : i32
    return %c0_i32, %c0_i32_0 : i32, i32
  }
  func.func @transform_6(%arg0: i32) -> (i32, i32) {
    %c0_i32 = arith.constant 0 : i32
    %c0_i32_0 = arith.constant 0 : i32
    %c0_i32_1 = arith.constant 0 : i32
    return %c0_i32, %c0_i32_0 : i32, i32
  }
  func.func @transform_7(%arg0: i32) -> (i32, i32, i32) {
    %c0_i32 = arith.constant 0 : i32
    %c0_i32_0 = arith.constant 0 : i32
    %c0_i32_1 = arith.constant 0 : i32
    return %arg0, %c0_i32, %c0_i32_0 : i32, i32, i32
  }
}

</mosaic_0001>

<bundles_post_ra>
// kernel: critic_forward.1
= control target key start
LH: loop header
LB: loop body
LE: loop exit
PB: predicated region body
PF: predicated region fallthrough
CT: control target
= control target key end

     0   :  { %s1583_s0 = inlined_call_operand.vmem [shape: f32[8,256], index: 0, kind: input, shape index: {}]   ;;  %s1584_s1 = inlined_call_operand.hbm [shape: bf16[256,512], index: 1, kind: input, shape index: {}]   ;;  %s1585_s2 = inlined_call_operand.vmem [shape: f32[1,512], index: 2, kind: input, shape index: {}]   ;;  %s1586_s3 = inlined_call_operand.hbm [shape: bf16[512,256], index: 3, kind: input, shape index: {}]   ;;  %s1587_s4 = inlined_call_operand.vmem [shape: f32[1,256], index: 4, kind: input, shape index: {}]   ;;  %s1588_s5 = inlined_call_operand.vmem [shape: bf16[1,256], index: 5, kind: input, shape index: {}]   ;;  %s1589_s6 = inlined_call_operand.<no memory space> [shape: f32[1,1], index: 6, kind: input, shape index: {}]   ;;  %s1590_s7 = inlined_call_operand.vmem [shape: f32[1,1,8], index: 7, kind: output, shape index: {}]  }
   0x1   :  { %v12_v0 = vstv %s1589_s6 }
   0x2   :  { %13 = vst [vmem:[#allocation2] sm:$0x1] %v12_v0 }
   0x3   :  { %14 = vsyncpa [#allocation4], 0 }
   0x4   :  { %15 = vsyncpa [#allocation6], 0  ;;  %s1503_s26 = smov [#allocation3]  }
   0x5   :  { %s23_s27 = sshll.u32 %s1503_s26, 4  ;;  %s24_s27 = int_to_ptr.vmem [resolvable:$true] %s23_s27 }
   0x6   :  { %s1467_s28 = scalar_lea.vmem %s24_s27, 8192  ;;  %p1472_p1 = scmp.lt.s32.totalorder %s24_s27, %s24_s27 }
   0x7   :  { %p1468_p0 = scmp.ne.s32.totalorder %s24_s27, %s1467_s28  ;;  %p1473_p2 = scmp.lt.s32.totalorder %s1467_s28, %s1467_s28 }
   0x9   :  { %p1474_p3 = por %p1473_p2, %p1472_p1 }
   0xb   :  { %p1475_p4 = pnand %p1474_p3, %p1468_p0 }
   0xd   :  { %1478 = shalt.err (!%p1475_p4)
}
   0xe   :  { %s1504_s29 = smov 256   ;;  %s1505_s30 = smov 16  }
   0xf   :  { %29 = dma.hbm_to_vmem [thread:$0]  %s1584_s1, 8192, %s24_s27, [#allocation4], %s1504_s29, %s1504_s29, %s1505_s30  }
  0x10   :  { %s1506_s6 = smov [#allocation5]  }
  0x11   :  { %s37_s10 = sshll.u32 %s1506_s6, 4  ;;  %s38_s10 = int_to_ptr.vmem [resolvable:$true] %s37_s10 }
  0x12   :  { %s1487_s11 = scalar_lea.vmem %s38_s10, 8192  ;;  %p1492_p6 = scmp.lt.s32.totalorder %s38_s10, %s38_s10 }
  0x13   :  { %p1488_p5 = scmp.ne.s32.totalorder %s38_s10, %s1487_s11  ;;  %p1493_p7 = scmp.lt.s32.totalorder %s1487_s11, %s1487_s11 }
  0x15   :  { %p1494_p8 = por %p1493_p7, %p1492_p6 }
  0x17   :  { %p1495_p9 = pnand %p1494_p8, %p1488_p5 }
  0x19   :  { %1498 = shalt.err (!%p1495_p9)
}
  0x1a   :  { %s1507_s12 = smov 128   ;;  %s1508_s13 = smov 8  }
  0x1b   :  { %43 = dma.hbm_to_vmem [thread:$0]  %s1586_s3, 8192, %s38_s10, [#allocation6], %s1507_s12, %s1507_s12, %s1508_s13  }
  0x1c   :  { %1499 = dma.done.wait [#allocation4], 8192  }
  0x1d   :  { %1500 = vsyncadd [#allocation4], 4294959104 }
  0x1e   :  { %1501 = dma.done.wait [#allocation6], 8192  }
  0x1f   :  { %1502 = vsyncadd [#allocation6], 4294959104  ;;  %v1267_v1 = vld [vmem:[#allocation3 + $0xe4] ss:$16 sps:$4 sm:$0xff]   ;;  %v1269_v2 = vld [vmem:[#allocation3 + $0xec] ss:$16 sps:$4 sm:$0xff]  }
  0x20   :  { %467 = vmatprep.subr.bf16.mxu0 %v1267_v1  ;;  %v1271_v3 = vld [vmem:[#allocation3 + $0xe0] ss:$16 sps:$4 sm:$0xff]   ;;  %v1272_v4 = vld [vmem:[#allocation3 + $0xe8] ss:$16 sps:$4 sm:$0xff]   ;;  %508 = vmatprep.subr.bf16.mxu1 %v1269_v2  ;;  %v1273_v5 = vld [vmem:[#allocation3 + $0xc4] ss:$16 sps:$4 sm:$0xff]  }
  0x21   :  { %468 = vmatpush1.bf16.msra.mxu0 %v1271_v3  ;;  %509 = vmatpush1.bf16.msra.mxu1 %v1272_v4  ;;  %v1275_v6 = vld [vmem:[#allocation3 + $0xcc] ss:$16 sps:$4 sm:$0xff]   ;;  %v1277_v7 = vld [vmem:[#allocation3 + $0xc0] ss:$16 sps:$4 sm:$0xff]   ;;  %v1278_v8 = vld [vmem:[#allocation3 + $0xc8] ss:$16 sps:$4 sm:$0xff]  }
  0x22   :  { %469 = vmatprep.subr.bf16.mxu0 %v1273_v5  ;;  %510 = vmatprep.subr.bf16.mxu1 %v1275_v6  ;;  %v1279_v9 = vld [vmem:[#allocation3 + $0xa4] ss:$16 sps:$4 sm:$0xff]   ;;  %v1281_v10 = vld [vmem:[#allocation3 + $0xac] ss:$16 sps:$4 sm:$0xff]   ;;  %v1283_v11 = vld [vmem:[#allocation3 + $0xa0] ss:$16 sps:$4 sm:$0xff]  }
  0x23   :  { %v1284_v12 = vld [vmem:[#allocation3 + $0xa8] ss:$16 sps:$4 sm:$0xff]   ;;  %v1285_v13 = vld [vmem:[#allocation3 + $0x84] ss:$16 sps:$4 sm:$0xff]   ;;  %v1287_v14 = vld [vmem:[#allocation3 + $0x8c] ss:$16 sps:$4 sm:$0xff]  }
  0x24   :  { %v1289_v15 = vld [vmem:[#allocation3 + $0x80] ss:$16 sps:$4 sm:$0xff]   ;;  %v1290_v16 = vld [vmem:[#allocation3 + $0x88] ss:$16 sps:$4 sm:$0xff]   ;;  %v1291_v17 = vld [vmem:[#allocation3 + $0x64] ss:$16 sps:$4 sm:$0xff]  }
  0x25   :  { %470 = vmatpush1.bf16.msra.mxu0 %v1277_v7  ;;  %511 = vmatpush1.bf16.msra.mxu1 %v1278_v8  ;;  %v1293_v18 = vld [vmem:[#allocation3 + $0x6c] ss:$16 sps:$4 sm:$0xff]   ;;  %v1295_v19 = vld [vmem:[#allocation3 + $0x60] ss:$16 sps:$4 sm:$0xff]   ;;  %v1296_v20 = vld [vmem:[#allocation3 + $0x68] ss:$16 sps:$4 sm:$0xff]  }
  0x26   :  { %471 = vmatprep.subr.bf16.mxu0 %v1279_v9  ;;  %512 = vmatprep.subr.bf16.mxu1 %v1281_v10  ;;  %v1297_v21 = vld [vmem:[#allocation3 + $0x44] ss:$16 sps:$4 sm:$0xff]   ;;  %v1299_v22 = vld [vmem:[#allocation3 + $0x4c] ss:$16 sps:$4 sm:$0xff]   ;;  %v1301_v23 = vld [vmem:[#allocation3 + $0x40] ss:$16 sps:$4 sm:$0xff]  }
  0x27   :  { %v1302_v24 = vld [vmem:[#allocation3 + $0x48] ss:$16 sps:$4 sm:$0xff]   ;;  %v1303_v25 = vld [vmem:[#allocation3 + $0x24] ss:$16 sps:$4 sm:$0xff]   ;;  %v1305_v26 = vld [vmem:[#allocation3 + $0x2c] ss:$16 sps:$4 sm:$0xff]  }
  0x28   :  { %v1307_v27 = vld [vmem:[#allocation3 + $0x20] ss:$16 sps:$4 sm:$0xff]   ;;  %v1308_v28 = vld [vmem:[#allocation3 + $0x28] ss:$16 sps:$4 sm:$0xff]   ;;  %v1309_v29 = vld [vmem:[#allocation3 + $0x4] ss:$16 sps:$4 sm:$0xff]  }
  0x29   :  { %472 = vmatpush1.bf16.msra.mxu0 %v1283_v11  ;;  %513 = vmatpush1.bf16.msra.mxu1 %v1284_v12  ;;  %v1311_v30 = vld [vmem:[#allocation3 + $0xc] ss:$16 sps:$4 sm:$0xff]   ;;  %v1313_v31 = vld [vmem:[#allocation3] ss:$16 sps:$4 sm:$0xff]   ;;  %v1314_v32 = vld [vmem:[#allocation3 + $0x8] ss:$16 sps:$4 sm:$0xff]  }
  0x2a   :  { %473 = vmatprep.subr.bf16.mxu0 %v1285_v13  ;;  %514 = vmatprep.subr.bf16.mxu1 %v1287_v14  ;;  %v1315_v33 = vld [vmem:[#allocation3 + $0x1e4] ss:$16 sps:$4 sm:$0xff]   ;;  %v1317_v34 = vld [vmem:[#allocation3 + $0x1ec] ss:$16 sps:$4 sm:$0xff]   ;;  %v1319_v35 = vld [vmem:[#allocation3 + $0x1e0] ss:$16 sps:$4 sm:$0xff]  }
  0x2b   :  { %v1320_v36 = vld [vmem:[#allocation3 + $0x1e8] ss:$16 sps:$4 sm:$0xff]   ;;  %v1321_v37 = vld [vmem:[#allocation3 + $0x1c4] ss:$16 sps:$4 sm:$0xff]   ;;  %v1323_v38 = vld [vmem:[#allocation3 + $0x1cc] ss:$16 sps:$4 sm:$0xff]  }
  0x2c   :  { %v1325_v39 = vld [vmem:[#allocation3 + $0x1c0] ss:$16 sps:$4 sm:$0xff]   ;;  %v1326_v40 = vld [vmem:[#allocation3 + $0x1c8] ss:$16 sps:$4 sm:$0xff]   ;;  %v1327_v41 = vld [vmem:[#allocation3 + $0x1a4] ss:$16 sps:$4 sm:$0xff]  }
  0x2d   :  { %474 = vmatpush1.bf16.msra.mxu0 %v1289_v15  ;;  %515 = vmatpush1.bf16.msra.mxu1 %v1290_v16  ;;  %v1329_v42 = vld [vmem:[#allocation3 + $0x1ac] ss:$16 sps:$4 sm:$0xff]   ;;  %v1331_v43 = vld [vmem:[#allocation3 + $0x1a0] ss:$16 sps:$4 sm:$0xff]   ;;  %v1332_v44 = vld [vmem:[#allocation3 + $0x1a8] ss:$16 sps:$4 sm:$0xff]  }
  0x2e   :  { %475 = vmatprep.subr.bf16.mxu0 %v1291_v17  ;;  %516 = vmatprep.subr.bf16.mxu1 %v1293_v18  ;;  %v1333_v45 = vld [vmem:[#allocation3 + $0x184] ss:$16 sps:$4 sm:$0xff]   ;;  %v1335_v46 = vld [vmem:[#allocation3 + $0x18c] ss:$16 sps:$4 sm:$0xff]   ;;  %v1337_v49 = vld [vmem:[#allocation3 + $0x180] ss:$16 sps:$4 sm:$0xff]  }
  0x2f   :  { %v58_v47 = vld [vmem:[%s1583_s0 + $0x8] sm:$0xff]  ;;  %v1343_v53 = vld [vmem:[#allocation3 + $0x160] ss:$16 sps:$4 sm:$0xff]   ;;  %v1365_v4 = vld [vmem:[#allocation5 + $0x74] ss:$8 sps:$4 sm:$0xff]   ;;  %vm1121_vm0 = vcmask 57344  }
  0x30   :  { %v60_v48 = vpack.c.bf16 %v58_v47, %v58_v47  ;;  %v1338_v50 = vld [vmem:[#allocation3 + $0x188] ss:$16 sps:$4 sm:$0xff]   ;;  %v1339_v51 = vld [vmem:[#allocation3 + $0x164] ss:$16 sps:$4 sm:$0xff]   ;;  %v1341_v52 = vld [vmem:[#allocation3 + $0x16c] ss:$16 sps:$4 sm:$0xff]  }
  0x31   :  { %476 = vmatpush1.bf16.msra.mxu0 %v1295_v19  ;;  %517 = vmatpush1.bf16.msra.mxu1 %v1296_v20  ;;  %v1344_v54 = vld [vmem:[#allocation3 + $0x168] ss:$16 sps:$4 sm:$0xff]   ;;  %v1345_v55 = vld [vmem:[#allocation3 + $0x144] ss:$16 sps:$4 sm:$0xff]   ;;  %v1347_v56 = vld [vmem:[#allocation3 + $0x14c] ss:$16 sps:$4 sm:$0xff]  }
  0x32   :  { %477 = vmatprep.subr.bf16.mxu0 %v1297_v21  ;;  %518 = vmatprep.subr.bf16.mxu1 %v1299_v22  ;;  %v1349_v57 = vld [vmem:[#allocation3 + $0x140] ss:$16 sps:$4 sm:$0xff]   ;;  %v1350_v58 = vld [vmem:[#allocation3 + $0x148] ss:$16 sps:$4 sm:$0xff]   ;;  %v1351_v59 = vld [vmem:[#allocation3 + $0x124] ss:$16 sps:$4 sm:$0xff]  }
  0x33   :  { %499 = vmatprep.mubr.bf16.mxu0 %v60_v48  ;;  %540 = vmatprep.mubr.bf16.mxu1 %v60_v48  ;;  %v1353_v60 = vld [vmem:[#allocation3 + $0x12c] ss:$16 sps:$4 sm:$0xff]   ;;  %v1355_v61 = vld [vmem:[#allocation3 + $0x120] ss:$16 sps:$4 sm:$0xff]   ;;  %v1356_v62 = vld [vmem:[#allocation3 + $0x128] ss:$16 sps:$4 sm:$0xff]  }
  0x34   :  { %v1357_v63 = vld [vmem:[#allocation3 + $0x104] ss:$16 sps:$4 sm:$0xff]   ;;  %v1359_v0 = vld [vmem:[#allocation3 + $0x10c] ss:$16 sps:$4 sm:$0xff]   ;;  %v1361_v1 = vld [vmem:[#allocation3 + $0x100] ss:$16 sps:$4 sm:$0xff]  }
  0x35   :  { %478 = vmatpush1.bf16.msra.mxu0 %v1301_v23  ;;  %519 = vmatpush1.bf16.msra.mxu1 %v1302_v24  ;;  %v1362_v2 = vld [vmem:[#allocation3 + $0x108] ss:$16 sps:$4 sm:$0xff]   ;;  %v57_v3 = vld [vmem:[%s1583_s0] sm:$0xff] }
  0x36   :  { %479 = vmatprep.subr.bf16.mxu0 %v1303_v25  ;;  %520 = vmatprep.subr.bf16.mxu1 %v1305_v26  ;;  %v1368_v5 = vld [vmem:[#allocation5 + $0x174] ss:$8 sps:$4 sm:$0xff]   ;;  %v59_v6 = vpack.c.bf16 %v57_v3, %v57_v3  ;;  %v1363_v7 = vld [vmem:[#allocation5 + $0x70] ss:$8 sps:$4 sm:$0xff]   ;;  %v1371_v9 = vld [vmem:[#allocation5 + $0x64] ss:$8 sps:$4 sm:$0xff]  }
  0x37   :  { %v1366_v8 = vld [vmem:[#allocation5 + $0x170] ss:$8 sps:$4 sm:$0xff]   ;;  %v1374_v10 = vld [vmem:[#allocation5 + $0x164] ss:$8 sps:$4 sm:$0xff]   ;;  %v1369_v11 = vld [vmem:[#allocation5 + $0x60] ss:$8 sps:$4 sm:$0xff]  }
  0x38   :  { %v1372_v12 = vld [vmem:[#allocation5 + $0x160] ss:$8 sps:$4 sm:$0xff]   ;;  %v1377_v13 = vld [vmem:[#allocation5 + $0x54] ss:$8 sps:$4 sm:$0xff]   ;;  %v1375_v15 = vld [vmem:[#allocation5 + $0x50] ss:$8 sps:$4 sm:$0xff]  }
  0x39   :  { %480 = vmatpush1.bf16.msra.mxu0 %v1307_v27  ;;  %521 = vmatpush1.bf16.msra.mxu1 %v1308_v28  ;;  %v1380_v14 = vld [vmem:[#allocation5 + $0x154] ss:$8 sps:$4 sm:$0xff]   ;;  %v1378_v16 = vld [vmem:[#allocation5 + $0x150] ss:$8 sps:$4 sm:$0xff]   ;;  %v1383_v17 = vld [vmem:[#allocation5 + $0x44] ss:$8 sps:$4 sm:$0xff]  }
  0x3a   :  { %481 = vmatprep.subr.bf16.mxu0 %v1309_v29  ;;  %522 = vmatprep.subr.bf16.mxu1 %v1311_v30  ;;  %v1386_v18 = vld [vmem:[#allocation5 + $0x144] ss:$8 sps:$4 sm:$0xff]   ;;  %v1381_v19 = vld [vmem:[#allocation5 + $0x40] ss:$8 sps:$4 sm:$0xff]   ;;  %v1389_v21 = vld [vmem:[#allocation5 + $0x34] ss:$8 sps:$4 sm:$0xff]  }
  0x3b   :  { %v1384_v20 = vld [vmem:[#allocation5 + $0x140] ss:$8 sps:$4 sm:$0xff]   ;;  %v1392_v22 = vld [vmem:[#allocation5 + $0x134] ss:$8 sps:$4 sm:$0xff]   ;;  %v1387_v23 = vld [vmem:[#allocation5 + $0x30] ss:$8 sps:$4 sm:$0xff]  }
  0x3c   :  { %v1390_v24 = vld [vmem:[#allocation5 + $0x130] ss:$8 sps:$4 sm:$0xff]   ;;  %v1395_v25 = vld [vmem:[#allocation5 + $0x24] ss:$8 sps:$4 sm:$0xff]   ;;  %v1393_v27 = vld [vmem:[#allocation5 + $0x20] ss:$8 sps:$4 sm:$0xff]  }
  0x3d   :  { %482 = vmatpush1.bf16.msra.mxu0 %v1313_v31  ;;  %523 = vmatpush1.bf16.msra.mxu1 %v1314_v32  ;;  %v1398_v26 = vld [vmem:[#allocation5 + $0x124] ss:$8 sps:$4 sm:$0xff]   ;;  %v1396_v28 = vld [vmem:[#allocation5 + $0x120] ss:$8 sps:$4 sm:$0xff]   ;;  %v1401_v29 = vld [vmem:[#allocation5 + $0x14] ss:$8 sps:$4 sm:$0xff]  }
  0x3e   :  { %483 = vmatprep.subr.bf16.mxu0 %v1315_v33  ;;  %524 = vmatprep.subr.bf16.mxu1 %v1317_v34  ;;  %v1404_v30 = vld [vmem:[#allocation5 + $0x114] ss:$8 sps:$4 sm:$0xff]   ;;  %v1399_v31 = vld [vmem:[#allocation5 + $0x10] ss:$8 sps:$4 sm:$0xff]   ;;  %v1407_v33 = vld [vmem:[#allocation5 + $0x4] ss:$8 sps:$4 sm:$0xff]  }
  0x3f   :  { %v1402_v32 = vld [vmem:[#allocation5 + $0x110] ss:$8 sps:$4 sm:$0xff]   ;;  %v1410_v34 = vld [vmem:[#allocation5 + $0x104] ss:$8 sps:$4 sm:$0xff]   ;;  %v1453_v3 = vld [vmem:[#allocation5 + $0x80] ss:$8 sps:$4 sm:$0xff]  }
  0x40   :  { %v1423_v47 = vld [vmem:[#allocation5 + $0xd0] ss:$8 sps:$4 sm:$0xff]  }
  0x41   :  { %484 = vmatpush2.bf16.msra.mxu0 %v1319_v35  ;;  %525 = vmatpush2.bf16.msra.mxu1 %v1320_v36  ;;  %v1405_v35 = vld [vmem:[#allocation5] ss:$8 sps:$4 sm:$0xff]   ;;  %v1426_v48 = vld [vmem:[#allocation5 + $0x1d0] ss:$8 sps:$4 sm:$0xff]  }
  0x42   :  { %485 = vmatprep.subr.bf16.mxu0 %v1321_v37  ;;  %526 = vmatprep.subr.bf16.mxu1 %v1323_v38  ;;  %v1408_v36 = vld [vmem:[#allocation5 + $0x100] ss:$8 sps:$4 sm:$0xff]   ;;  %v1413_v37 = vld [vmem:[#allocation5 + $0xf4] ss:$8 sps:$4 sm:$0xff]  }
  0x43   :  { %v1416_v38 = vld [vmem:[#allocation5 + $0x1f4] ss:$8 sps:$4 sm:$0xff]  }
  0x45   :  { %486 = vmatpush2.bf16.msra.mxu0 %v1325_v39  ;;  %527 = vmatpush2.bf16.msra.mxu1 %v1326_v40  ;;  %v1411_v39 = vld [vmem:[#allocation5 + $0xf0] ss:$8 sps:$4 sm:$0xff]  }
  0x46   :  { %487 = vmatprep.subr.bf16.mxu0 %v1327_v41  ;;  %528 = vmatprep.subr.bf16.mxu1 %v1329_v42  ;;  %v1414_v40 = vld [vmem:[#allocation5 + $0x1f0] ss:$8 sps:$4 sm:$0xff]   ;;  %v1419_v41 = vld [vmem:[#allocation5 + $0xe4] ss:$8 sps:$4 sm:$0xff]  }
  0x47   :  { %v1422_v42 = vld [vmem:[#allocation5 + $0x1e4] ss:$8 sps:$4 sm:$0xff]  }
  0x49   :  { %488 = vmatpush2.bf16.msra.mxu0 %v1331_v43  ;;  %529 = vmatpush2.bf16.msra.mxu1 %v1332_v44  ;;  %v1417_v43 = vld [vmem:[#allocation5 + $0xe0] ss:$8 sps:$4 sm:$0xff]  }
  0x4a   :  { %489 = vmatprep.subr.bf16.mxu0 %v1333_v45  ;;  %530 = vmatprep.subr.bf16.mxu1 %v1335_v46  ;;  %v1420_v44 = vld [vmem:[#allocation5 + $0x1e0] ss:$8 sps:$4 sm:$0xff]   ;;  %v1425_v45 = vld [vmem:[#allocation5 + $0xd4] ss:$8 sps:$4 sm:$0xff]  }
  0x4b   :  { %v1428_v46 = vld [vmem:[#allocation5 + $0x1d4] ss:$8 sps:$4 sm:$0xff]  }
  0x4d   :  { %490 = vmatpush2.bf16.msra.mxu0 %v1337_v49  ;;  %531 = vmatpush2.bf16.msra.mxu1 %v1338_v50  ;;  %v1431_v49 = vld [vmem:[#allocation5 + $0xc4] ss:$8 sps:$4 sm:$0xff]  }
  0x4e   :  { %491 = vmatprep.subr.bf16.mxu0 %v1339_v51  ;;  %532 = vmatprep.subr.bf16.mxu1 %v1341_v52  ;;  %v1434_v50 = vld [vmem:[#allocation5 + $0x1c4] ss:$8 sps:$4 sm:$0xff]   ;;  %v1429_v51 = vld [vmem:[#allocation5 + $0xc0] ss:$8 sps:$4 sm:$0xff]  }
  0x4f   :  { %v1432_v52 = vld [vmem:[#allocation5 + $0x1c0] ss:$8 sps:$4 sm:$0xff]  }
  0x51   :  { %492 = vmatpush2.bf16.msra.mxu0 %v1343_v53  ;;  %533 = vmatpush2.bf16.msra.mxu1 %v1344_v54  ;;  %v1437_v53 = vld [vmem:[#allocation5 + $0xb4] ss:$8 sps:$4 sm:$0xff]  }
  0x52   :  { %493 = vmatprep.subr.bf16.mxu0 %v1345_v55  ;;  %534 = vmatprep.subr.bf16.mxu1 %v1347_v56  ;;  %v1440_v54 = vld [vmem:[#allocation5 + $0x1b4] ss:$8 sps:$4 sm:$0xff]   ;;  %v1435_v55 = vld [vmem:[#allocation5 + $0xb0] ss:$8 sps:$4 sm:$0xff]  }
  0x53   :  { %v1438_v56 = vld [vmem:[#allocation5 + $0x1b0] ss:$8 sps:$4 sm:$0xff]  }
  0x55   :  { %494 = vmatpush2.bf16.msra.mxu0 %v1349_v57  ;;  %535 = vmatpush2.bf16.msra.mxu1 %v1350_v58  ;;  %v1443_v57 = vld [vmem:[#allocation5 + $0xa4] ss:$8 sps:$4 sm:$0xff]  }
  0x56   :  { %495 = vmatprep.subr.bf16.mxu0 %v1351_v59  ;;  %536 = vmatprep.subr.bf16.mxu1 %v1353_v60  ;;  %v1446_v58 = vld [vmem:[#allocation5 + $0x1a4] ss:$8 sps:$4 sm:$0xff]   ;;  %v1441_v59 = vld [vmem:[#allocation5 + $0xa0] ss:$8 sps:$4 sm:$0xff]  }
  0x57   :  { %v1444_v60 = vld [vmem:[#allocation5 + $0x1a0] ss:$8 sps:$4 sm:$0xff]  }
  0x59   :  { %496 = vmatpush2.bf16.msra.mxu0 %v1355_v61  ;;  %537 = vmatpush2.bf16.msra.mxu1 %v1356_v62  ;;  %v1449_v61 = vld [vmem:[#allocation5 + $0x94] ss:$8 sps:$4 sm:$0xff]  }
  0x5a   :  { %497 = vmatprep.subr.bf16.mxu0 %v1357_v63  ;;  %538 = vmatprep.subr.bf16.mxu1 %v1359_v0  ;;  %v1452_v62 = vld [vmem:[#allocation5 + $0x194] ss:$8 sps:$4 sm:$0xff]   ;;  %v1447_v63 = vld [vmem:[#allocation5 + $0x90] ss:$8 sps:$4 sm:$0xff]  }
  0x5b   :  { %v1450_v0 = vld [vmem:[#allocation5 + $0x190] ss:$8 sps:$4 sm:$0xff]  }
  0x5d   :  { %498 = vmatpush2.bf16.msra.mxu0 %v1361_v1  ;;  %539 = vmatpush2.bf16.msra.mxu1 %v1362_v2  ;;  %v1455_v1 = vld [vmem:[#allocation5 + $0x84] ss:$8 sps:$4 sm:$0xff]  }
  0x5e   :  { %957 = vmatprep.subr.bf16.mxu0 %v1365_v4  ;;  %998 = vmatprep.subr.bf16.mxu1 %v1368_v5  ;;  %v1458_v2 = vld [vmem:[#allocation5 + $0x184] ss:$8 sps:$4 sm:$0xff]   ;;  %v1456_v4 = vld [vmem:[#allocation5 + $0x180] ss:$8 sps:$4 sm:$0xff]   ;;  %v127_v5 = vlaneseq }
  0x60   :  { %500 = vmatmul.mubr.bf16.vlgmr.msra.gmra.mxu0 %v59_v6  ;;  %541 = vmatmul.mubr.bf16.vlgmr.msra.gmra.mxu1 %v59_v6  ;;  %v128_v6 = vshrl.u32 %v127_v5, 7 }
  0x61   :  { %958 = vmatpush1.bf16.msra.mxu0 %v1363_v7  ;;  %999 = vmatpush1.bf16.msra.mxu1 %v1366_v8 }
  0x62   :  { %959 = vmatprep.subr.bf16.mxu0 %v1371_v9  ;;  %1000 = vmatprep.subr.bf16.mxu1 %v1374_v10  ;;  %v1566_v7 = vsub.s32 0, %v128_v6  ;;  %v137_v8 = vsub.s32 2, %v128_v6  ;;  %v125_v9 = vld [vmem:[%s1585_s2] sm:$0xf]  ;;  %v133_v10 = vsub.s32 1, %v128_v6 }
  0x65   :  { %960 = vmatpush1.bf16.msra.mxu0 %v1369_v11  ;;  %1001 = vmatpush1.bf16.msra.mxu1 %v1372_v12  ;;  %v141_v11 = vsub.s32 3, %v128_v6  ;;  %v130_v12 = vrot.slane %v125_v9, %v1566_v7 }
  0x66   :  { %961 = vmatprep.subr.bf16.mxu0 %v1377_v13  ;;  %1002 = vmatprep.subr.bf16.mxu1 %v1380_v14  ;;  %v138_v13 = vrot.slane %v125_v9, %v137_v8  ;;  %v134_v14 = vrot.slane %v125_v9, %v133_v10 }
  0x69   :  { %962 = vmatpush1.bf16.msra.mxu0 %v1375_v15  ;;  %1003 = vmatpush1.bf16.msra.mxu1 %v1378_v16  ;;  %v142_v15 = vrot.slane %v125_v9, %v141_v11 }
  0x6a   :  { %963 = vmatprep.subr.bf16.mxu0 %v1383_v17  ;;  %1004 = vmatprep.subr.bf16.mxu1 %v1386_v18 }
  0x6d   :  { %964 = vmatpush1.bf16.msra.mxu0 %v1381_v19  ;;  %1005 = vmatpush1.bf16.msra.mxu1 %v1384_v20 }
  0x6e   :  { %965 = vmatprep.subr.bf16.mxu0 %v1389_v21  ;;  %1006 = vmatprep.subr.bf16.mxu1 %v1392_v22 }
  0x71   :  { %966 = vmatpush1.bf16.msra.mxu0 %v1387_v23  ;;  %1007 = vmatpush1.bf16.msra.mxu1 %v1390_v24 }
  0x72   :  { %967 = vmatprep.subr.bf16.mxu0 %v1395_v25  ;;  %1008 = vmatprep.subr.bf16.mxu1 %v1398_v26 }
  0x75   :  { %968 = vmatpush1.bf16.msra.mxu0 %v1393_v27  ;;  %1009 = vmatpush1.bf16.msra.mxu1 %v1396_v28 }
  0x76   :  { %969 = vmatprep.subr.bf16.mxu0 %v1401_v29  ;;  %1010 = vmatprep.subr.bf16.mxu1 %v1404_v30 }
  0x79   :  { %970 = vmatpush1.bf16.msra.mxu0 %v1399_v31  ;;  %1011 = vmatpush1.bf16.msra.mxu1 %v1402_v32 }
  0x7a   :  { %971 = vmatprep.subr.bf16.mxu0 %v1407_v33  ;;  %1012 = vmatprep.subr.bf16.mxu1 %v1410_v34 }
  0x7d   :  { %972 = vmatpush1.bf16.msra.mxu0 %v1405_v35  ;;  %1013 = vmatpush1.bf16.msra.mxu1 %v1408_v36 }
  0x7e   :  { %973 = vmatprep.subr.bf16.mxu0 %v1413_v37  ;;  %1014 = vmatprep.subr.bf16.mxu1 %v1416_v38 }
  0x81   :  { %974 = vmatpush2.bf16.msra.mxu0 %v1411_v39  ;;  %1015 = vmatpush2.bf16.msra.mxu1 %v1414_v40  ;;  %v1509_v40 = vmov 1966171168  }
  0x82   :  { %975 = vmatprep.subr.bf16.mxu0 %v1419_v41  ;;  %1016 = vmatprep.subr.bf16.mxu1 %v1422_v42  ;;  %v1066_v41 = vunpack.c.l.s4 %v1509_v40  ;;  %v1257_v42 = vld.sshfl [vmem:[%s1588_s5] sm:$0x11 pattern:$0x75316420] }
  0x85   :  { %976 = vmatpush2.bf16.msra.mxu0 %v1417_v43  ;;  %1017 = vmatpush2.bf16.msra.mxu1 %v1420_v44  ;;  %v1067_v43 = vunpack.c.0.s8 %v1066_v41  ;;  %v1064_v44 = vcombine.high %v1257_v42, %v1257_v42 }
  0x86   :  { %977 = vmatprep.subr.bf16.mxu0 %v1425_v45  ;;  %1018 = vmatprep.subr.bf16.mxu1 %v1428_v46 }
  0x87   :  { %v1070_v45 = vsub.s32 %v1067_v43, %v128_v6 }
  0x89   :  { %978 = vmatpush2.bf16.msra.mxu0 %v1423_v47  ;;  %1019 = vmatpush2.bf16.msra.mxu1 %v1426_v48  ;;  %v1078_v46 = vrot.slane %v1064_v44, %v1070_v45  ;;  %v1071_v47 = vrot.slane %v1257_v42, %v1070_v45  ;;  %v1046_v48 = vld [vmem:[#allocation2] sm:$0x1] }
  0x8a   :  { %979 = vmatprep.subr.bf16.mxu0 %v1431_v49  ;;  %1020 = vmatprep.subr.bf16.mxu1 %v1434_v50  ;;  %v1510_v49 = vmov 0   ;;  %v625_v50 = vld [vmem:[%s1587_s4] sm:$0x3] }
  0x8b   :  { %1266 = vset.pattern.permute.xlu0 %v1510_v49 }
  0x8c   :  { %1049 = vperm.xlu0 %1266, %v1046_v48  }
  0x8d   :  { %980 = vmatpush2.bf16.msra.mxu0 %v1429_v51  ;;  %1021 = vmatpush2.bf16.msra.mxu1 %v1432_v52  ;;  %v630_v51 = vrot.slane %v625_v50, %v1566_v7  ;;  %v634_v52 = vrot.slane %v625_v50, %v133_v10 }
  0x8e   :  { %981 = vmatprep.subr.bf16.mxu0 %v1437_v53  ;;  %1022 = vmatprep.subr.bf16.mxu1 %v1440_v54 }
  0x91   :  { %982 = vmatpush2.bf16.msra.mxu0 %v1435_v55  ;;  %1023 = vmatpush2.bf16.msra.mxu1 %v1438_v56 }
  0x92   :  { %983 = vmatprep.subr.bf16.mxu0 %v1443_v57  ;;  %1024 = vmatprep.subr.bf16.mxu1 %v1446_v58 }
  0x95   :  { %984 = vmatpush2.bf16.msra.mxu0 %v1441_v59  ;;  %1025 = vmatpush2.bf16.msra.mxu1 %v1444_v60 }
  0x96   :  { %985 = vmatprep.subr.bf16.mxu0 %v1449_v61  ;;  %1026 = vmatprep.subr.bf16.mxu1 %v1452_v62 }
  0x99   :  { %986 = vmatpush2.bf16.msra.mxu0 %v1447_v63  ;;  %1027 = vmatpush2.bf16.msra.mxu1 %v1450_v0 }
  0x9a   :  { %987 = vmatprep.subr.bf16.mxu0 %v1455_v1  ;;  %1028 = vmatprep.subr.bf16.mxu1 %v1458_v2 }
  0x9d   :  { %988 = vmatpush2.bf16.msra.mxu0 %v1453_v3  ;;  %1029 = vmatpush2.bf16.msra.mxu1 %v1456_v4 }
 0x107   :  { %v1050_v8 = vpop.permute.xlu0 %1049 }
 0x108   :  { %v1055_v9 = vrot.slane %v1050_v8, %v1566_v7 }
 0x120   :  { %v501_v16 = vpop.f32.mrf.mxu0  ;;  %v542_v17 = vpop.f32.mrf.mxu1 }
 0x121   :  { %v502_v18 = vadd.f32 %v501_v16, %v130_v12  ;;  %v543_v19 = vadd.f32 %v542_v17, %v138_v13 }
 0x122   :  { %v503_v20 = vpop.f32.mrf.mxu0  ;;  %v544_v21 = vpop.f32.mrf.mxu1 }
 0x123   :  { %v549_v22 = vmul.f32 0.2, %v502_v18  ;;  %v551_v23 = vmul.f32 0.2, %v543_v19  ;;  %v504_v24 = vadd.f32 %v503_v20, %v134_v14  ;;  %v545_v25 = vadd.f32 %v544_v21, %v142_v15 }
 0x124   :  { %v505_v26 = vpop.f32.mrf.mxu0  ;;  %v546_v27 = vpop.f32.mrf.mxu1 }
 0x125   :  { %v550_v28 = vmul.f32 0.2, %v504_v24  ;;  %v552_v29 = vmul.f32 0.2, %v545_v25  ;;  %v553_v30 = vmax.f32 %v502_v18, %v549_v22  ;;  %v555_v31 = vmax.f32 %v543_v19, %v551_v23 }
 0x126   :  { %v506_v32 = vpop.f32.mrf.mxu0  ;;  %v547_v33 = vpop.f32.mrf.mxu1 }
 0x127   :  { %v554_v34 = vmax.f32 %v504_v24, %v550_v28  ;;  %v556_v35 = vmax.f32 %v545_v25, %v552_v29  ;;  %v557_v38 = vpack.c.bf16 %v553_v30, %v553_v30  ;;  %v559_v39 = vpack.c.bf16 %v555_v31, %v555_v31 }
 0x129   :  { %v558_v36 = vpack.c.bf16 %v554_v34, %v554_v34  ;;  %v560_v37 = vpack.c.bf16 %v556_v35, %v556_v35 }
 0x12b   :  { %989 = vmatprep.mubr.bf16.mxu0 %v558_v36  ;;  %1030 = vmatprep.mubr.bf16.mxu1 %v560_v37 }
 0x12c   :  { %990 = vmatmul.mubr.bf16.vlgmr.msra.gmra.mxu0 %v557_v38  ;;  %1031 = vmatmul.mubr.bf16.vlgmr.msra.gmra.mxu1 %v559_v39 }
 0x12d   :  { %1113 = vmatprep.mubr.bf16.mxu0 %v1078_v46 }
 0x1ec   :  { %v991_v53 = vpop.f32.mrf.mxu0  ;;  %v1032_v54 = vpop.f32.mrf.mxu1 }
 0x1ed   :  { %v992_v55 = vadd.f32 %v991_v53, %v630_v51 }
 0x1ee   :  { %v993_v56 = vpop.f32.mrf.mxu0  ;;  %v1034_v57 = vpop.f32.mrf.mxu1 }
 0x1ef   :  { %v1033_v58 = vadd.f32 %v1032_v54, %v992_v55  ;;  %v994_v59 = vadd.f32 %v993_v56, %v634_v52 }
 0x1f0   :  { %v995_v60 = vpop.f32.mrf.mxu0  ;;  %v1036_v61 = vpop.f32.mrf.mxu1 }
 0x1f1   :  { %v1039_v62 = vmul.f32 0.2, %v1033_v58  ;;  %v1035_v63 = vadd.f32 %v1034_v57, %v994_v59 }
 0x1f2   :  { %v996_v0 = vpop.f32.mrf.mxu0  ;;  %v1037_v1 = vpop.f32.mrf.mxu1 }
 0x1f3   :  { %v1040_v2 = vmul.f32 0.2, %v1035_v63  ;;  %v1041_v3 = vmax.f32 %v1033_v58, %v1039_v62 }
 0x1f5   :  { %v1042_v4 = vmax.f32 %v1035_v63, %v1040_v2  ;;  %v1044_v6 = vpack.c.bf16 %v1041_v3, %v1041_v3 }
 0x1f7   :  { %v1045_v5 = vpack.c.bf16 %v1042_v4, %v1042_v4 }
 0x1f9   :  { %1095 = vmatprep.subr.bf16.mxu0 %v1045_v5 }
 0x1fa   :  { %1096 = vmatpush1.bf16.xpose.msra.mxu0 %v1044_v6 }
 0x201   :  { %1114 = vmatmul.mubr.bf16.vlgmr.msra.gmra.mxu0 %v1071_v47 }
 0x2c1   :  { %v1115_v10 = vpop.f32.mrf.mxu0 }
 0x2c2   :  { %v1116_v11 = vadd.f32 %v1115_v10, %v1055_v9 }
 0x2c3   :  { %v1117_v12 = vpop.f32.mrf.mxu0 }
 0x2c4   :  { %1122 = vst.msk [vmem:[%s1590_s7] sm:$0x1] %vm1121_vm0, %v1116_v11 }
 0x2c5   :  { %v1118_v13 = vpop.f32.mrf.mxu0 }
 0x2c7   :  { %v1119_v14 = vpop.f32.mrf.mxu0 }
 0x2c8   :  { %1127 = vsyncpa [#allocation4], 1 }
 0x2c9   :  { %1128 = vsyncpa [#allocation6], 1 }

</bundles_post_ra>
